<compile_context>
chip_gen: v7x
topology: tpu7x:2x2x1
jax: 0.10.0
libtpu: 0.0.40
codegen_flags: <defaults>
</compile_context>

<pallas_src>
import functools
import math

import jax
import jax.numpy as jnp
from jax import lax
from jax.experimental import pallas as pl
from jax.experimental.pallas import tpu as pltpu


# ---------------------------------------------------------------------------
# Fused kernel: QKV projections + block-diagonal stacked-head attention + fc,
# whole (flattened-batch) problem in one invocation.
# ---------------------------------------------------------------------------
def fused_self_attention_kernel(
    q_ref, k_ref, v_ref,                 # (Lq, H), (Lk, H), (Lk, H); L = B*S
    wq_ref, bq_ref,                      # (H, H), (1, H)
    wk_ref, bk_ref,
    wv_ref, bv_ref,
    wfc_ref, bfc_ref,                    # (H, H), (1, H)
    mask_ref,                            # (Tq, Tk) additive block-diag mask
    o_ref,                               # (Lq, H)
    qs_ref, ks_ref, vs_ref,              # scratch: (Tq, dh), (Tk, dh), (Tk, dh)
    xm_ref,                              # scratch: (Lq, H)
    *, n_heads, inv_scale):
    Lq, H = q_ref.shape
    Lk = k_ref.shape[0]
    dh = H // n_heads

    # --- Fused full-width projections: one (L,H)@(H,H) MXU dot per stream ---
    q = jnp.dot(q_ref[...], wq_ref[...], preferred_element_type=jnp.float32) + bq_ref[...]
    k = jnp.dot(k_ref[...], wk_ref[...], preferred_element_type=jnp.float32) + bk_ref[...]
    v = jnp.dot(v_ref[...], wv_ref[...], preferred_element_type=jnp.float32) + bv_ref[...]
    # Fold 1/sqrt(d_head) into Q (L*dh multiplies instead of Tq*Tk divides).
    q = q * inv_scale

    # --- Relayout heads from lanes to sublanes: rows ordered (head, batch, seq).
    # Static slices + plain scratch stores only (no in-kernel transpose/reshape).
    for h in range(n_heads):
        lo = h * dh
        qs_ref[h * Lq:(h + 1) * Lq, :] = q[:, lo:lo + dh]
        ks_ref[h * Lk:(h + 1) * Lk, :] = k[:, lo:lo + dh]
        vs_ref[h * Lk:(h + 1) * Lk, :] = v[:, lo:lo + dh]

    qs = qs_ref[...]                     # (Tq, dh)
    ks = ks_ref[...]                     # (Tk, dh)
    vs = vs_ref[...]                     # (Tk, dh)

    # --- ONE block-diagonal attention for all heads x batch elements ---
    energy = lax.dot_general(qs, ks, (((1,), (1,)), ((), ())),
                             preferred_element_type=jnp.float32)   # (Tq, Tk)
    energy = energy + mask_ref[...]      # -1e30 off the (head,batch) diagonal blocks

    # Numerically-stable softmax along keys (single chain, f32 math).
    m = jnp.max(energy, axis=-1, keepdims=True)
    p = jnp.exp(energy - m)              # masked entries underflow to exactly 0
    l = jnp.sum(p, axis=-1, keepdims=True)
    r = pl.reciprocal(l, approx=True)    # EUP slot (free vs VALU divides)
    r = r * (2.0 - l * r)                # one Newton step -> ~f32-exact
    attn = p * r

    xs = jnp.dot(attn, vs, preferred_element_type=jnp.float32)     # (Tq, dh)

    # --- Unstack heads back onto lanes: (Tq, dh) -> (Lq, H) head-major merge ---
    for h in range(n_heads):
        xm_ref[:, h * dh:(h + 1) * dh] = xs[h * Lq:(h + 1) * Lq, :]

    # --- Fused fc over all heads: one (Lq,H)@(H,H) dot ---
    # NOTE: H=32 (<128 lanes) -> masked store; acceptable at this size (see TODO).
    o_ref[...] = (jnp.dot(xm_ref[...], wfc_ref[...],
                          preferred_element_type=jnp.float32) + bfc_ref[...])


# ---------------------------------------------------------------------------
# Forward wrapper: host-side flatten/mask prep (tiny, one-off) + pallas_call.
# ---------------------------------------------------------------------------
def self_attention_forward(params, query, key, value, *, n_heads):
    B, Sq, H = query.shape
    Sk = key.shape[1]
    assert H % n_heads == 0
    d_head = H // n_heads
    inv_scale = 1.0 / math.sqrt(d_head)      # static Python float (jit-safe)

    Lq, Lk = B * Sq, B * Sk
    Tq, Tk = n_heads * Lq, n_heads * Lk

    q2 = query.reshape(Lq, H)
    k2 = key.reshape(Lk, H)
    v2 = value.reshape(Lk, H)

    bq = params["b_q"].reshape(1, H)
    bk = params["b_k"].reshape(1, H)
    bv = params["b_v"].reshape(1, H)
    bfc = params["b_fc"].reshape(1, H)

    # Precomputed additive block-diagonal mask for stacked-head attention:
    # row r = h*Lq + b*Sq + i  ->  block id r//Sq = h*B + b (same for columns).
    rblk = jnp.arange(Tq, dtype=jnp.int32) // Sq
    cblk = jnp.arange(Tk, dtype=jnp.int32) // Sk
    neg_mask = jnp.where(rblk[:, None] == cblk[None, :],
                         0.0, -1e30).astype(jnp.float32)

    def full_spec(shape):
        return pl.BlockSpec(shape, lambda i: (0,) * len(shape))

    kernel = functools.partial(
        fused_self_attention_kernel, n_heads=n_heads, inv_scale=inv_scale)

    out2 = pl.pallas_call(
        kernel,
        out_shape=jax.ShapeDtypeStruct((Lq, H), jnp.float32),
        grid_spec=pltpu.PrefetchScalarGridSpec(
            num_scalar_prefetch=0,
            grid=(1,),                     # single step: B=2 work << per-step overhead
            in_specs=[full_spec((Lq, H)), full_spec((Lk, H)), full_spec((Lk, H)),
                      full_spec((H, H)), full_spec((1, H)),
                      full_spec((H, H)), full_spec((1, H)),
                      full_spec((H, H)), full_spec((1, H)),
                      full_spec((H, H)), full_spec((1, H)),
                      full_spec((Tq, Tk))],
            out_specs=full_spec((Lq, H)),
            scratch_shapes=[pltpu.VMEM((Tq, d_head), jnp.float32),
                            pltpu.VMEM((Tk, d_head), jnp.float32),
                            pltpu.VMEM((Tk, d_head), jnp.float32),
                            pltpu.VMEM((Lq, H), jnp.float32)],
        ),
        compiler_params=pltpu.CompilerParams(
            dimension_semantics=("arbitrary",),
        ),
    )(q2, k2, v2,
      params["w_q"], bq, params["w_k"], bk, params["w_v"], bv,
      params["w_fc"], bfc, neg_mask)

    return out2.reshape(B, Sq, H)


# ---------------------------------------------------------------------------
# Pure-JAX reference for a correctness sanity check.
# ---------------------------------------------------------------------------
def self_attention_ref(params, query, key, value, *, n_heads):
    B, Sq, H = query.shape
    Sk = key.shape[1]
    d_head = H // n_heads
    scale = math.sqrt(d_head)
    Q = query @ params["w_q"] + params["b_q"]
    K = key @ params["w_k"] + params["b_k"]
    V = value @ params["w_v"] + params["b_v"]
    Q = Q.reshape(B, Sq, n_heads, d_head).transpose(0, 2, 1, 3)
    K = K.reshape(B, Sk, n_heads, d_head).transpose(0, 2, 1, 3)
    V = V.reshape(B, Sk, n_heads, d_head).transpose(0, 2, 1, 3)
    energy = jnp.einsum("bhqd,bhkd->bhqk", Q, K) / scale
    attn = jax.nn.softmax(energy, axis=-1)
    x = jnp.einsum("bhqk,bhkd->bhqd", attn, V)
    x = x.transpose(0, 2, 1, 3).reshape(B, Sq, H)
    return x @ params["w_fc"] + params["b_fc"]


def init_params(key, hid_dim):
    # Deterministic synthetic init (uniform, roughly matching nn.Linear scale).
    ks = jax.random.split(key, 8)
    bound = 1.0 / math.sqrt(hid_dim)

    def u(k, shape):
        return jax.random.uniform(k, shape, jnp.float32, -bound, bound)

    return {
        "w_q": u(ks[0], (hid_dim, hid_dim)), "b_q": u(ks[1], (hid_dim,)),
        "w_k": u(ks[2], (hid_dim, hid_dim)), "b_k": u(ks[3], (hid_dim,)),
        "w_v": u(ks[4], (hid_dim, hid_dim)), "b_v": u(ks[5], (hid_dim,)),
        "w_fc": u(ks[6], (hid_dim, hid_dim)), "b_fc": u(ks[7], (hid_dim,)),
    }


if __name__ == "__main__":
    batch, seq, hid_dim, n_heads = 2, 8, 32, 4

    root = jax.random.PRNGKey(0)
    kp, kq, kk, kv = jax.random.split(root, 4)
    params = init_params(kp, hid_dim)

    query = jax.random.normal(kq, (batch, seq, hid_dim), jnp.float32)
    key = jax.random.normal(kk, (batch, seq, hid_dim), jnp.float32)
    value = jax.random.normal(kv, (batch, seq, hid_dim), jnp.float32)

    out = self_attention_forward(params, query, key, value, n_heads=n_heads)
    out = jax.block_until_ready(out)

    ref = self_attention_ref(params, query, key, value, n_heads=n_heads)
    assert out.shape == (batch, seq, hid_dim)
    max_err = float(jnp.max(jnp.abs(out - ref)))
    assert jnp.allclose(out, ref, atol=1e-4, rtol=1e-4), f"max abs err {max_err}"

    print("KERNEL_OK")
</pallas_src>

<mosaic_0001>
module attributes {stable_mosaic.version = 11 : i64} {
  func.func @fused_self_attention_kernel(%arg0: i32, %arg1: memref<16x32xf32, #tpu.memory_space<vmem>>, %arg2: memref<16x32xf32, #tpu.memory_space<vmem>>, %arg3: memref<16x32xf32, #tpu.memory_space<vmem>>, %arg4: memref<32x32xf32, #tpu.memory_space<vmem>>, %arg5: memref<1x32xf32, #tpu.memory_space<vmem>>, %arg6: memref<32x32xf32, #tpu.memory_space<vmem>>, %arg7: memref<1x32xf32, #tpu.memory_space<vmem>>, %arg8: memref<32x32xf32, #tpu.memory_space<vmem>>, %arg9: memref<1x32xf32, #tpu.memory_space<vmem>>, %arg10: memref<32x32xf32, #tpu.memory_space<vmem>>, %arg11: memref<1x32xf32, #tpu.memory_space<vmem>>, %arg12: memref<64x64xf32, #tpu.memory_space<vmem>>, %arg13: memref<16x32xf32, #tpu.memory_space<vmem>>, %arg14: memref<64x8xf32, #tpu.memory_space<vmem>>, %arg15: memref<64x8xf32, #tpu.memory_space<vmem>>, %arg16: memref<64x8xf32, #tpu.memory_space<vmem>>, %arg17: memref<16x32xf32, #tpu.memory_space<vmem>>) attributes {dimension_semantics = [#tpu.dimension_semantics<arbitrary>], iteration_bounds = array<i64: 1>, scalar_prefetch = 0 : i64, scratch_operands = 4 : i64, tpu.core_type = #tpu.core_type<tc>, window_params = [{pipeline_mode = #tpu.pipeline_mode<synchronous>, transform_indices = @transform_0, window_bounds = array<i64: 16, 32>}, {pipeline_mode = #tpu.pipeline_mode<synchronous>, transform_indices = @transform_1, window_bounds = array<i64: 16, 32>}, {pipeline_mode = #tpu.pipeline_mode<synchronous>, transform_indices = @transform_2, window_bounds = array<i64: 16, 32>}, {pipeline_mode = #tpu.pipeline_mode<synchronous>, transform_indices = @transform_3, window_bounds = array<i64: 32, 32>}, {pipeline_mode = #tpu.pipeline_mode<synchronous>, transform_indices = @transform_4, window_bounds = array<i64: 1, 32>}, {pipeline_mode = #tpu.pipeline_mode<synchronous>, transform_indices = @transform_5, window_bounds = array<i64: 32, 32>}, {pipeline_mode = #tpu.pipeline_mode<synchronous>, transform_indices = @transform_6, window_bounds = array<i64: 1, 32>}, {pipeline_mode = #tpu.pipeline_mode<synchronous>, transform_indices = @transform_7, window_bounds = array<i64: 32, 32>}, {pipeline_mode = #tpu.pipeline_mode<synchronous>, transform_indices = @transform_8, window_bounds = array<i64: 1, 32>}, {pipeline_mode = #tpu.pipeline_mode<synchronous>, transform_indices = @transform_9, window_bounds = array<i64: 32, 32>}, {pipeline_mode = #tpu.pipeline_mode<synchronous>, transform_indices = @transform_10, window_bounds = array<i64: 1, 32>}, {pipeline_mode = #tpu.pipeline_mode<synchronous>, transform_indices = @transform_11, window_bounds = array<i64: 64, 64>}, {pipeline_mode = #tpu.pipeline_mode<synchronous>, transform_indices = @transform_12, window_bounds = array<i64: 16, 32>}]} {
    %c0 = arith.constant 0 : index
    %c0_0 = arith.constant 0 : index
    %0 = vector.load %arg1[%c0, %c0_0] : memref<16x32xf32, #tpu.memory_space<vmem>>, vector<16x32xf32>
    %c0_1 = arith.constant 0 : index
    %c0_2 = arith.constant 0 : index
    %1 = vector.load %arg4[%c0_1, %c0_2] : memref<32x32xf32, #tpu.memory_space<vmem>>, vector<32x32xf32>
    %cst = arith.constant dense<0.000000e+00> : vector<16x32xf32>
    %2 = tpu.matmul %0, %1, %cst {dimension_numbers = #tpu.dot_dimension_numbers<[1], [0], [0], [1], [0, 0, 1, 1], [], []>} : vector<16x32xf32>, vector<32x32xf32>, vector<16x32xf32> -> vector<16x32xf32>
    %c0_3 = arith.constant 0 : index
    %c0_4 = arith.constant 0 : index
    %3 = vector.load %arg5[%c0_3, %c0_4] : memref<1x32xf32, #tpu.memory_space<vmem>>, vector<1x32xf32>
    %4 = vector.broadcast %3 : vector<1x32xf32> to vector<16x32xf32>
    %5 = arith.addf %2, %4 : vector<16x32xf32>
    %c0_5 = arith.constant 0 : index
    %c0_6 = arith.constant 0 : index
    %6 = vector.load %arg2[%c0_5, %c0_6] : memref<16x32xf32, #tpu.memory_space<vmem>>, vector<16x32xf32>
    %c0_7 = arith.constant 0 : index
    %c0_8 = arith.constant 0 : index
    %7 = vector.load %arg6[%c0_7, %c0_8] : memref<32x32xf32, #tpu.memory_space<vmem>>, vector<32x32xf32>
    %cst_9 = arith.constant dense<0.000000e+00> : vector<16x32xf32>
    %8 = tpu.matmul %6, %7, %cst_9 {dimension_numbers = #tpu.dot_dimension_numbers<[1], [0], [0], [1], [0, 0, 1, 1], [], []>} : vector<16x32xf32>, vector<32x32xf32>, vector<16x32xf32> -> vector<16x32xf32>
    %c0_10 = arith.constant 0 : index
    %c0_11 = arith.constant 0 : index
    %9 = vector.load %arg7[%c0_10, %c0_11] : memref<1x32xf32, #tpu.memory_space<vmem>>, vector<1x32xf32>
    %10 = vector.broadcast %9 : vector<1x32xf32> to vector<16x32xf32>
    %11 = arith.addf %8, %10 : vector<16x32xf32>
    %c0_12 = arith.constant 0 : index
    %c0_13 = arith.constant 0 : index
    %12 = vector.load %arg3[%c0_12, %c0_13] : memref<16x32xf32, #tpu.memory_space<vmem>>, vector<16x32xf32>
    %c0_14 = arith.constant 0 : index
    %c0_15 = arith.constant 0 : index
    %13 = vector.load %arg8[%c0_14, %c0_15] : memref<32x32xf32, #tpu.memory_space<vmem>>, vector<32x32xf32>
    %cst_16 = arith.constant dense<0.000000e+00> : vector<16x32xf32>
    %14 = tpu.matmul %12, %13, %cst_16 {dimension_numbers = #tpu.dot_dimension_numbers<[1], [0], [0], [1], [0, 0, 1, 1], [], []>} : vector<16x32xf32>, vector<32x32xf32>, vector<16x32xf32> -> vector<16x32xf32>
    %c0_17 = arith.constant 0 : index
    %c0_18 = arith.constant 0 : index
    %15 = vector.load %arg9[%c0_17, %c0_18] : memref<1x32xf32, #tpu.memory_space<vmem>>, vector<1x32xf32>
    %16 = vector.broadcast %15 : vector<1x32xf32> to vector<16x32xf32>
    %17 = arith.addf %14, %16 : vector<16x32xf32>
    %cst_19 = arith.constant 0.353553385 : f32
    %18 = vector.broadcast %cst_19 : f32 to vector<16x32xf32>
    %19 = arith.mulf %5, %18 : vector<16x32xf32>
    %20 = vector.extract_strided_slice %19 {offsets = [0, 0], sizes = [16, 8], strides = [1, 1]} : vector<16x32xf32> to vector<16x8xf32>
    %c0_20 = arith.constant 0 : index
    %c0_21 = arith.constant 0 : index
    %21 = vector.load %arg14[%c0_20, %c0_21] : memref<64x8xf32, #tpu.memory_space<vmem>>, vector<16x8xf32>
    tpu.vector_store %arg14[%c0_20, %c0_21], %20 {strides = array<i32>} : memref<64x8xf32, #tpu.memory_space<vmem>>, vector<16x8xf32>,
    %22 = vector.extract_strided_slice %11 {offsets = [0, 0], sizes = [16, 8], strides = [1, 1]} : vector<16x32xf32> to vector<16x8xf32>
    %c0_22 = arith.constant 0 : index
    %c0_23 = arith.constant 0 : index
    %23 = vector.load %arg15[%c0_22, %c0_23] : memref<64x8xf32, #tpu.memory_space<vmem>>, vector<16x8xf32>
    tpu.vector_store %arg15[%c0_22, %c0_23], %22 {strides = array<i32>} : memref<64x8xf32, #tpu.memory_space<vmem>>, vector<16x8xf32>,
    %24 = vector.extract_strided_slice %17 {offsets = [0, 0], sizes = [16, 8], strides = [1, 1]} : vector<16x32xf32> to vector<16x8xf32>
    %c0_24 = arith.constant 0 : index
    %c0_25 = arith.constant 0 : index
    %25 = vector.load %arg16[%c0_24, %c0_25] : memref<64x8xf32, #tpu.memory_space<vmem>>, vector<16x8xf32>
    tpu.vector_store %arg16[%c0_24, %c0_25], %24 {strides = array<i32>} : memref<64x8xf32, #tpu.memory_space<vmem>>, vector<16x8xf32>,
    %26 = vector.extract_strided_slice %19 {offsets = [0, 8], sizes = [16, 8], strides = [1, 1]} : vector<16x32xf32> to vector<16x8xf32>
    %c16 = arith.constant 16 : index
    %c0_26 = arith.constant 0 : index
    %27 = vector.load %arg14[%c16, %c0_26] : memref<64x8xf32, #tpu.memory_space<vmem>>, vector<16x8xf32>
    tpu.vector_store %arg14[%c16, %c0_26], %26 {strides = array<i32>} : memref<64x8xf32, #tpu.memory_space<vmem>>, vector<16x8xf32>,
    %28 = vector.extract_strided_slice %11 {offsets = [0, 8], sizes = [16, 8], strides = [1, 1]} : vector<16x32xf32> to vector<16x8xf32>
    %c16_27 = arith.constant 16 : index
    %c0_28 = arith.constant 0 : index
    %29 = vector.load %arg15[%c16_27, %c0_28] : memref<64x8xf32, #tpu.memory_space<vmem>>, vector<16x8xf32>
    tpu.vector_store %arg15[%c16_27, %c0_28], %28 {strides = array<i32>} : memref<64x8xf32, #tpu.memory_space<vmem>>, vector<16x8xf32>,
    %30 = vector.extract_strided_slice %17 {offsets = [0, 8], sizes = [16, 8], strides = [1, 1]} : vector<16x32xf32> to vector<16x8xf32>
    %c16_29 = arith.constant 16 : index
    %c0_30 = arith.constant 0 : index
    %31 = vector.load %arg16[%c16_29, %c0_30] : memref<64x8xf32, #tpu.memory_space<vmem>>, vector<16x8xf32>
    tpu.vector_store %arg16[%c16_29, %c0_30], %30 {strides = array<i32>} : memref<64x8xf32, #tpu.memory_space<vmem>>, vector<16x8xf32>,
    %32 = vector.extract_strided_slice %19 {offsets = [0, 16], sizes = [16, 8], strides = [1, 1]} : vector<16x32xf32> to vector<16x8xf32>
    %c32 = arith.constant 32 : index
    %c0_31 = arith.constant 0 : index
    %33 = vector.load %arg14[%c32, %c0_31] : memref<64x8xf32, #tpu.memory_space<vmem>>, vector<16x8xf32>
    tpu.vector_store %arg14[%c32, %c0_31], %32 {strides = array<i32>} : memref<64x8xf32, #tpu.memory_space<vmem>>, vector<16x8xf32>,
    %34 = vector.extract_strided_slice %11 {offsets = [0, 16], sizes = [16, 8], strides = [1, 1]} : vector<16x32xf32> to vector<16x8xf32>
    %c32_32 = arith.constant 32 : index
    %c0_33 = arith.constant 0 : index
    %35 = vector.load %arg15[%c32_32, %c0_33] : memref<64x8xf32, #tpu.memory_space<vmem>>, vector<16x8xf32>
    tpu.vector_store %arg15[%c32_32, %c0_33], %34 {strides = array<i32>} : memref<64x8xf32, #tpu.memory_space<vmem>>, vector<16x8xf32>,
    %36 = vector.extract_strided_slice %17 {offsets = [0, 16], sizes = [16, 8], strides = [1, 1]} : vector<16x32xf32> to vector<16x8xf32>
    %c32_34 = arith.constant 32 : index
    %c0_35 = arith.constant 0 : index
    %37 = vector.load %arg16[%c32_34, %c0_35] : memref<64x8xf32, #tpu.memory_space<vmem>>, vector<16x8xf32>
    tpu.vector_store %arg16[%c32_34, %c0_35], %36 {strides = array<i32>} : memref<64x8xf32, #tpu.memory_space<vmem>>, vector<16x8xf32>,
    %38 = vector.extract_strided_slice %19 {offsets = [0, 24], sizes = [16, 8], strides = [1, 1]} : vector<16x32xf32> to vector<16x8xf32>
    %c48 = arith.constant 48 : index
    %c0_36 = arith.constant 0 : index
    %39 = vector.load %arg14[%c48, %c0_36] : memref<64x8xf32, #tpu.memory_space<vmem>>, vector<16x8xf32>
    tpu.vector_store %arg14[%c48, %c0_36], %38 {strides = array<i32>} : memref<64x8xf32, #tpu.memory_space<vmem>>, vector<16x8xf32>,
    %40 = vector.extract_strided_slice %11 {offsets = [0, 24], sizes = [16, 8], strides = [1, 1]} : vector<16x32xf32> to vector<16x8xf32>
    %c48_37 = arith.constant 48 : index
    %c0_38 = arith.constant 0 : index
    %41 = vector.load %arg15[%c48_37, %c0_38] : memref<64x8xf32, #tpu.memory_space<vmem>>, vector<16x8xf32>
    tpu.vector_store %arg15[%c48_37, %c0_38], %40 {strides = array<i32>} : memref<64x8xf32, #tpu.memory_space<vmem>>, vector<16x8xf32>,
    %42 = vector.extract_strided_slice %17 {offsets = [0, 24], sizes = [16, 8], strides = [1, 1]} : vector<16x32xf32> to vector<16x8xf32>
    %c48_39 = arith.constant 48 : index
    %c0_40 = arith.constant 0 : index
    %43 = vector.load %arg16[%c48_39, %c0_40] : memref<64x8xf32, #tpu.memory_space<vmem>>, vector<16x8xf32>
    tpu.vector_store %arg16[%c48_39, %c0_40], %42 {strides = array<i32>} : memref<64x8xf32, #tpu.memory_space<vmem>>, vector<16x8xf32>,
    %c0_41 = arith.constant 0 : index
    %c0_42 = arith.constant 0 : index
    %44 = vector.load %arg14[%c0_41, %c0_42] : memref<64x8xf32, #tpu.memory_space<vmem>>, vector<64x8xf32>
    %c0_43 = arith.constant 0 : index
    %c0_44 = arith.constant 0 : index
    %45 = vector.load %arg15[%c0_43, %c0_44] : memref<64x8xf32, #tpu.memory_space<vmem>>, vector<64x8xf32>
    %c0_45 = arith.constant 0 : index
    %c0_46 = arith.constant 0 : index
    %46 = vector.load %arg16[%c0_45, %c0_46] : memref<64x8xf32, #tpu.memory_space<vmem>>, vector<64x8xf32>
    %cst_47 = arith.constant dense<0.000000e+00> : vector<64x64xf32>
    %47 = tpu.matmul %44, %45, %cst_47 {dimension_numbers = #tpu.dot_dimension_numbers<[1], [1], [0], [0], [0, 0, 1, 0], [], []>} : vector<64x8xf32>, vector<64x8xf32>, vector<64x64xf32> -> vector<64x64xf32>
    %c0_48 = arith.constant 0 : index
    %c0_49 = arith.constant 0 : index
    %48 = vector.load %arg12[%c0_48, %c0_49] : memref<64x64xf32, #tpu.memory_space<vmem>>, vector<64x64xf32>
    %49 = arith.addf %47, %48 : vector<64x64xf32>
    %cst_50 = arith.constant dense<0xFF800000> : vector<64xf32>
    %50 = vector.multi_reduction <maximumf>, %49, %cst_50 [1] : vector<64x64xf32> to vector<64xf32>
    %51 = vector.shape_cast %50 : vector<64xf32> to vector<64x1xf32>
    %52 = vector.broadcast %51 : vector<64x1xf32> to vector<64x64xf32>
    %53 = arith.subf %49, %52 : vector<64x64xf32>
    %54 = math.exp %53 : vector<64x64xf32>
    %cst_51 = arith.constant dense<0.000000e+00> : vector<64xf32>
    %55 = vector.multi_reduction <add>, %54, %cst_51 [1] : vector<64x64xf32> to vector<64xf32>
    %56 = vector.shape_cast %55 : vector<64xf32> to vector<64x1xf32>
    %57 = tpu.reciprocal %56 {approx = true} : vector<64x1xf32> -> vector<64x1xf32>
    %58 = arith.mulf %56, %57 : vector<64x1xf32>
    %cst_52 = arith.constant 2.000000e+00 : f32
    %59 = vector.broadcast %cst_52 : f32 to vector<64x1xf32>
    %60 = arith.subf %59, %58 : vector<64x1xf32>
    %61 = arith.mulf %57, %60 : vector<64x1xf32>
    %62 = vector.broadcast %61 : vector<64x1xf32> to vector<64x64xf32>
    %63 = arith.mulf %54, %62 : vector<64x64xf32>
    %cst_53 = arith.constant dense<0.000000e+00> : vector<64x8xf32>
    %64 = tpu.matmul %63, %46, %cst_53 {dimension_numbers = #tpu.dot_dimension_numbers<[1], [0], [0], [1], [0, 0, 1, 1], [], []>} : vector<64x64xf32>, vector<64x8xf32>, vector<64x8xf32> -> vector<64x8xf32>
    %65 = vector.extract_strided_slice %64 {offsets = [0, 0], sizes = [16, 8], strides = [1, 1]} : vector<64x8xf32> to vector<16x8xf32>
    %c0_54 = arith.constant 0 : index
    %c0_55 = arith.constant 0 : index
    %66 = vector.load %arg17[%c0_54, %c0_55] : memref<16x32xf32, #tpu.memory_space<vmem>>, vector<16x8xf32>
    tpu.vector_store %arg17[%c0_54, %c0_55], %65 {strides = array<i32>} : memref<16x32xf32, #tpu.memory_space<vmem>>, vector<16x8xf32>,
    %67 = vector.extract_strided_slice %64 {offsets = [16, 0], sizes = [16, 8], strides = [1, 1]} : vector<64x8xf32> to vector<16x8xf32>
    %c0_56 = arith.constant 0 : index
    %c8 = arith.constant 8 : index
    %68 = vector.load %arg17[%c0_56, %c8] : memref<16x32xf32, #tpu.memory_space<vmem>>, vector<16x8xf32>
    tpu.vector_store %arg17[%c0_56, %c8], %67 {strides = array<i32>} : memref<16x32xf32, #tpu.memory_space<vmem>>, vector<16x8xf32>,
    %69 = vector.extract_strided_slice %64 {offsets = [32, 0], sizes = [16, 8], strides = [1, 1]} : vector<64x8xf32> to vector<16x8xf32>
    %c0_57 = arith.constant 0 : index
    %c16_58 = arith.constant 16 : index
    %70 = vector.load %arg17[%c0_57, %c16_58] : memref<16x32xf32, #tpu.memory_space<vmem>>, vector<16x8xf32>
    tpu.vector_store %arg17[%c0_57, %c16_58], %69 {strides = array<i32>} : memref<16x32xf32, #tpu.memory_space<vmem>>, vector<16x8xf32>,
    %71 = vector.extract_strided_slice %64 {offsets = [48, 0], sizes = [16, 8], strides = [1, 1]} : vector<64x8xf32> to vector<16x8xf32>
    %c0_59 = arith.constant 0 : index
    %c24 = arith.constant 24 : index
    %72 = vector.load %arg17[%c0_59, %c24] : memref<16x32xf32, #tpu.memory_space<vmem>>, vector<16x8xf32>
    tpu.vector_store %arg17[%c0_59, %c24], %71 {strides = array<i32>} : memref<16x32xf32, #tpu.memory_space<vmem>>, vector<16x8xf32>,
    %c0_60 = arith.constant 0 : index
    %c0_61 = arith.constant 0 : index
    %73 = vector.load %arg17[%c0_60, %c0_61] : memref<16x32xf32, #tpu.memory_space<vmem>>, vector<16x32xf32>
    %c0_62 = arith.constant 0 : index
    %c0_63 = arith.constant 0 : index
    %74 = vector.load %arg10[%c0_62, %c0_63] : memref<32x32xf32, #tpu.memory_space<vmem>>, vector<32x32xf32>
    %cst_64 = arith.constant dense<0.000000e+00> : vector<16x32xf32>
    %75 = tpu.matmul %73, %74, %cst_64 {dimension_numbers = #tpu.dot_dimension_numbers<[1], [0], [0], [1], [0, 0, 1, 1], [], []>} : vector<16x32xf32>, vector<32x32xf32>, vector<16x32xf32> -> vector<16x32xf32>
    %c0_65 = arith.constant 0 : index
    %c0_66 = arith.constant 0 : index
    %76 = vector.load %arg11[%c0_65, %c0_66] : memref<1x32xf32, #tpu.memory_space<vmem>>, vector<1x32xf32>
    %77 = vector.broadcast %76 : vector<1x32xf32> to vector<16x32xf32>
    %78 = arith.addf %75, %77 : vector<16x32xf32>
    %c0_67 = arith.constant 0 : index
    %c0_68 = arith.constant 0 : index
    %79 = vector.load %arg13[%c0_67, %c0_68] : memref<16x32xf32, #tpu.memory_space<vmem>>, vector<16x32xf32>
    tpu.vector_store %arg13[%c0_67, %c0_68], %78 {strides = array<i32>} : memref<16x32xf32, #tpu.memory_space<vmem>>, vector<16x32xf32>,
    return
  }
  func.func @transform_0(%arg0: i32) -> (i32, i32) {
    %c0_i32 = arith.constant 0 : i32
    %c0_i32_0 = arith.constant 0 : i32
    %c0_i32_1 = arith.constant 0 : i32
    return %c0_i32, %c0_i32_0 : i32, i32
  }
  func.func @transform_1(%arg0: i32) -> (i32, i32) {
    %c0_i32 = arith.constant 0 : i32
    %c0_i32_0 = arith.constant 0 : i32
    %c0_i32_1 = arith.constant 0 : i32
    return %c0_i32, %c0_i32_0 : i32, i32
  }
  func.func @transform_2(%arg0: i32) -> (i32, i32) {
    %c0_i32 = arith.constant 0 : i32
    %c0_i32_0 = arith.constant 0 : i32
    %c0_i32_1 = arith.constant 0 : i32
    return %c0_i32, %c0_i32_0 : i32, i32
  }
  func.func @transform_3(%arg0: i32) -> (i32, i32) {
    %c0_i32 = arith.constant 0 : i32
    %c0_i32_0 = arith.constant 0 : i32
    %c0_i32_1 = arith.constant 0 : i32
    return %c0_i32, %c0_i32_0 : i32, i32
  }
  func.func @transform_4(%arg0: i32) -> (i32, i32) {
    %c0_i32 = arith.constant 0 : i32
    %c0_i32_0 = arith.constant 0 : i32
    %c0_i32_1 = arith.constant 0 : i32
    return %c0_i32, %c0_i32_0 : i32, i32
  }
  func.func @transform_5(%arg0: i32) -> (i32, i32) {
    %c0_i32 = arith.constant 0 : i32
    %c0_i32_0 = arith.constant 0 : i32
    %c0_i32_1 = arith.constant 0 : i32
    return %c0_i32, %c0_i32_0 : i32, i32
  }
  func.func @transform_6(%arg0: i32) -> (i32, i32) {
    %c0_i32 = arith.constant 0 : i32
    %c0_i32_0 = arith.constant 0 : i32
    %c0_i32_1 = arith.constant 0 : i32
    return %c0_i32, %c0_i32_0 : i32, i32
  }
  func.func @transform_7(%arg0: i32) -> (i32, i32) {
    %c0_i32 = arith.constant 0 : i32
    %c0_i32_0 = arith.constant 0 : i32
    %c0_i32_1 = arith.constant 0 : i32
    return %c0_i32, %c0_i32_0 : i32, i32
  }
  func.func @transform_8(%arg0: i32) -> (i32, i32) {
    %c0_i32 = arith.constant 0 : i32
    %c0_i32_0 = arith.constant 0 : i32
    %c0_i32_1 = arith.constant 0 : i32
    return %c0_i32, %c0_i32_0 : i32, i32
  }
  func.func @transform_9(%arg0: i32) -> (i32, i32) {
    %c0_i32 = arith.constant 0 : i32
    %c0_i32_0 = arith.constant 0 : i32
    %c0_i32_1 = arith.constant 0 : i32
    return %c0_i32, %c0_i32_0 : i32, i32
  }
  func.func @transform_10(%arg0: i32) -> (i32, i32) {
    %c0_i32 = arith.constant 0 : i32
    %c0_i32_0 = arith.constant 0 : i32
    %c0_i32_1 = arith.constant 0 : i32
    return %c0_i32, %c0_i32_0 : i32, i32
  }
  func.func @transform_11(%arg0: i32) -> (i32, i32) {
    %c0_i32 = arith.constant 0 : i32
    %c0_i32_0 = arith.constant 0 : i32
    %c0_i32_1 = arith.constant 0 : i32
    return %c0_i32, %c0_i32_0 : i32, i32
  }
  func.func @transform_12(%arg0: i32) -> (i32, i32) {
    %c0_i32 = arith.constant 0 : i32
    %c0_i32_0 = arith.constant 0 : i32
    %c0_i32_1 = arith.constant 0 : i32
    return %c0_i32, %c0_i32_0 : i32, i32
  }
}

</mosaic_0001>

<bundles_post_ra>
// kernel: tpu_custom_call.1
= control target key start
LH: loop header
LB: loop body
LE: loop exit
PB: predicated region body
PF: predicated region fallthrough
CT: control target
= control target key end

     0   :  { %17 = vsyncpa [#allocation7], 0  ;;  %s2036_s0 = inlined_call_operand.hbm [shape: f32[16,32], index: 0, kind: input, shape index: {}]   ;;  %s2037_s1 = inlined_call_operand.hbm [shape: f32[16,32], index: 1, kind: input, shape index: {}]   ;;  %s2038_s2 = inlined_call_operand.hbm [shape: f32[16,32], index: 2, kind: input, shape index: {}]   ;;  %s2039_s3 = inlined_call_operand.hbm [shape: f32[32,32], index: 3, kind: input, shape index: {}]   ;;  %s2040_s4 = inlined_call_operand.vmem [shape: f32[1,32], index: 4, kind: input, shape index: {}]   ;;  %s2041_s5 = inlined_call_operand.hbm [shape: f32[32,32], index: 5, kind: input, shape index: {}]   ;;  %s2042_s6 = inlined_call_operand.vmem [shape: f32[1,32], index: 6, kind: input, shape index: {}]   ;;  %s2043_s7 = inlined_call_operand.hbm [shape: f32[32,32], index: 7, kind: input, shape index: {}]   ;;  %s2044_s8 = inlined_call_operand.hbm [shape: f32[1,32], index: 8, kind: input, shape index: {}]   ;;  %s2045_s9 = inlined_call_operand.vmem [shape: f32[32,32], index: 9, kind: input, shape index: {}]   ;;  %s2046_s10 = inlined_call_operand.vmem [shape: f32[1,32], index: 10, kind: input, shape index: {}]   ;;  %s2047_s11 = inlined_call_operand.hbm [shape: f32[64,64], index: 11, kind: input, shape index: {}]   ;;  %s2048_s12 = inlined_call_operand.hbm [shape: f32[16,32], index: 12, kind: output, shape index: {}]  }
   0x1   :  { %18 = vsyncpa [#allocation10], 0 }
   0x2   :  { %19 = vsyncpa [#allocation13], 0 }
   0x3   :  { %20 = vsyncpa [#allocation16], 0 }
   0x4   :  { %21 = vsyncpa [#allocation19], 0 }
   0x5   :  { %22 = vsyncpa [#allocation8], 0  ;;  %s1620_s21 = smov [#allocation9]   ;;  %s1621_s23 = smov [#allocation12]  }
   0x6   :  { %s40_s22 = sshll.u32 %s1620_s21, 4  ;;  %s64_s24 = sshll.u32 %s1621_s23, 4  ;;  %s41_s22 = int_to_ptr.vmem [resolvable:$true] %s40_s22  ;;  %s1701_s24 = int_to_ptr.vmem [resolvable:$true] %s64_s24 }
   0x7   :  { %s1410_s27 = scalar_lea.hbm %s2037_s1, 256 }
   0x8   :  { %p1411_p0 = scmp.ne.s32.totalorder %s2037_s1, %s1410_s27  ;;  %p1414_p1 = scmp.lt.u32.totalorder %s1410_s27, %s2037_s1 }
   0xa   :  { %p1416_p2 = pnand %p1414_p1, %p1411_p0 }
   0xc   :  { %1419 = shalt.err (!%p1416_p2)
}
   0xd   :  { %s1420_s14 = scalar_lea.vmem %s41_s22, 256  ;;  %p1425_p4 = scmp.lt.s32.totalorder %s41_s22, %s41_s22 }
   0xe   :  { %p1421_p3 = scmp.ne.s32.totalorder %s41_s22, %s1420_s14  ;;  %p1426_p5 = scmp.lt.s32.totalorder %s1420_s14, %s1420_s14 }
  0x10   :  { %p1427_p6 = por %p1426_p5, %p1425_p4 }
  0x12   :  { %p1428_p7 = pnand %p1427_p6, %p1421_p3 }
  0x14   :  { %1431 = shalt.err (!%p1428_p7)
}
  0x15   :  { %s1622_s15 = smov 128   ;;  %s1623_s16 = smov 8  }
  0x16   :  { %46 = dma.hbm_to_vmem [thread:$0]  %s2037_s1, 256, %s41_s22, [#allocation10], %s1622_s15, %s1622_s15, %s1623_s16  }
  0x17   :  { %s1432_s21 = scalar_lea.hbm %s2039_s3, 512 }
  0x18   :  { %p1433_p8 = scmp.ne.s32.totalorder %s2039_s3, %s1432_s21  ;;  %p1436_p9 = scmp.lt.u32.totalorder %s1432_s21, %s2039_s3 }
  0x1a   :  { %p1438_p10 = pnand %p1436_p9, %p1433_p8 }
  0x1c   :  { %1441 = shalt.err (!%p1438_p10)
}
  0x1d   :  { %s1442_s28 = scalar_lea.vmem %s1701_s24, 512  ;;  %p1447_p12 = scmp.lt.s32.totalorder %s1701_s24, %s1701_s24 }
  0x1e   :  { %p1443_p11 = scmp.ne.s32.totalorder %s1701_s24, %s1442_s28  ;;  %p1448_p13 = scmp.lt.s32.totalorder %s1442_s28, %s1442_s28 }
  0x20   :  { %p1449_p0 = por %p1448_p13, %p1447_p12 }
  0x22   :  { %p1450_p1 = pnand %p1449_p0, %p1443_p11 }
  0x24   :  { %1453 = shalt.err (!%p1450_p1)
}
  0x25   :  { %70 = dma.hbm_to_vmem [thread:$0]  %s2039_s3, 512, %s1701_s24, [#allocation13], %s1622_s15, %s1622_s15, %s1623_s16  }
  0x26   :  { %s1624_s29 = smov [#allocation15]   ;;  %s1625_s13 = smov [#allocation6]  }
  0x27   :  { %s92_s30 = sshll.u32 %s1624_s29, 4  ;;  %s28_s14 = sshll.u32 %s1625_s13, 4  ;;  %s93_s30 = int_to_ptr.vmem [resolvable:$true] %s92_s30  ;;  %s1738_s14 = int_to_ptr.vmem [resolvable:$true] %s28_s14 }
  0x28   :  { %s1454_s19 = scalar_lea.hbm %s2043_s7, 512 }
  0x29   :  { %p1455_p2 = scmp.ne.s32.totalorder %s2043_s7, %s1454_s19  ;;  %p1458_p3 = scmp.lt.u32.totalorder %s1454_s19, %s2043_s7 }
  0x2b   :  { %p1460_p4 = pnand %p1458_p3, %p1455_p2 }
  0x2d   :  { %1463 = shalt.err (!%p1460_p4)
}
  0x2e   :  { %s1464_s3 = scalar_lea.vmem %s93_s30, 512  ;;  %p1469_p6 = scmp.lt.s32.totalorder %s93_s30, %s93_s30 }
  0x2f   :  { %p1465_p5 = scmp.ne.s32.totalorder %s93_s30, %s1464_s3  ;;  %p1470_p7 = scmp.lt.s32.totalorder %s1464_s3, %s1464_s3 }
  0x31   :  { %p1471_p8 = por %p1470_p7, %p1469_p6 }
  0x33   :  { %p1472_p9 = pnand %p1471_p8, %p1465_p5 }
  0x35   :  { %1475 = shalt.err (!%p1472_p9)
}
  0x36   :  { %98 = dma.hbm_to_vmem [thread:$0]  %s2043_s7, 512, %s93_s30, [#allocation16], %s1622_s15, %s1622_s15, %s1623_s16  }
  0x37   :  { %s1476_s1 = scalar_lea.hbm %s2036_s0, 256 }
  0x38   :  { %p1477_p10 = scmp.ne.s32.totalorder %s2036_s0, %s1476_s1  ;;  %p1480_p11 = scmp.lt.u32.totalorder %s1476_s1, %s2036_s0 }
  0x3a   :  { %p1482_p12 = pnand %p1480_p11, %p1477_p10 }
  0x3c   :  { %1485 = shalt.err (!%p1482_p12)
}
  0x3d   :  { %s1486_s18 = scalar_lea.vmem %s1738_s14, 256  ;;  %p1491_p0 = scmp.lt.s32.totalorder %s1738_s14, %s1738_s14 }
  0x3e   :  { %p1487_p13 = scmp.ne.s32.totalorder %s1738_s14, %s1486_s18  ;;  %p1492_p1 = scmp.lt.s32.totalorder %s1486_s18, %s1486_s18 }
  0x40   :  { %p1493_p2 = por %p1492_p1, %p1491_p0 }
  0x42   :  { %p1494_p3 = pnand %p1493_p2, %p1487_p13 }
  0x44   :  { %1497 = shalt.err (!%p1494_p3)
}
  0x45   :  { %34 = dma.hbm_to_vmem [thread:$0]  %s2036_s0, 256, %s1738_s14, [#allocation7], %s1622_s15, %s1622_s15, %s1623_s16  }
  0x46   :  { %s1626_s19 = smov [#allocation11]   ;;  %s1627_s21 = smov [#allocation14]  }
  0x47   :  { %s52_s20 = sshll.u32 %s1626_s19, 4  ;;  %s78_s23 = sshll.u32 %s1627_s21, 4  ;;  %s53_s20 = int_to_ptr.vmem [resolvable:$true] %s52_s20  ;;  %s1775_s23 = int_to_ptr.vmem [resolvable:$true] %s78_s23 }
  0x48   :  { %s1498_s24 = scalar_lea.hbm %s2038_s2, 256 }
  0x49   :  { %p1499_p4 = scmp.ne.s32.totalorder %s2038_s2, %s1498_s24  ;;  %p1502_p5 = scmp.lt.u32.totalorder %s1498_s24, %s2038_s2 }
  0x4b   :  { %p1504_p6 = pnand %p1502_p5, %p1499_p4 }
  0x4d   :  { %1507 = shalt.err (!%p1504_p6)
}
  0x4e   :  { %s1508_s0 = scalar_lea.vmem %s53_s20, 256  ;;  %p1513_p8 = scmp.lt.s32.totalorder %s53_s20, %s53_s20 }
  0x4f   :  { %p1509_p7 = scmp.ne.s32.totalorder %s53_s20, %s1508_s0  ;;  %p1514_p9 = scmp.lt.s32.totalorder %s1508_s0, %s1508_s0 }
  0x51   :  { %p1515_p10 = por %p1514_p9, %p1513_p8 }
  0x53   :  { %p1516_p11 = pnand %p1515_p10, %p1509_p7 }
  0x55   :  { %1519 = shalt.err (!%p1516_p11)
}
  0x56   :  { %58 = dma.hbm_to_vmem [thread:$0]  %s2038_s2, 256, %s53_s20, [#allocation10], %s1622_s15, %s1622_s15, %s1623_s16  }
  0x57   :  { %s1520_s17 = scalar_lea.hbm %s2041_s5, 512 }
  0x58   :  { %p1521_p12 = scmp.ne.s32.totalorder %s2041_s5, %s1520_s17  ;;  %p1524_p13 = scmp.lt.u32.totalorder %s1520_s17, %s2041_s5 }
  0x5a   :  { %p1526_p0 = pnand %p1524_p13, %p1521_p12 }
  0x5c   :  { %1529 = shalt.err (!%p1526_p0)
}
  0x5d   :  { %s1530_s21 = scalar_lea.vmem %s1775_s23, 512  ;;  %p1535_p2 = scmp.lt.s32.totalorder %s1775_s23, %s1775_s23 }
  0x5e   :  { %p1531_p1 = scmp.ne.s32.totalorder %s1775_s23, %s1530_s21  ;;  %p1536_p3 = scmp.lt.s32.totalorder %s1530_s21, %s1530_s21 }
  0x60   :  { %p1537_p4 = por %p1536_p3, %p1535_p2 }
  0x62   :  { %p1538_p5 = pnand %p1537_p4, %p1531_p1 }
  0x64   :  { %1541 = shalt.err (!%p1538_p5)
}
  0x65   :  { %84 = dma.hbm_to_vmem [thread:$0]  %s2041_s5, 512, %s1775_s23, [#allocation13], %s1622_s15, %s1622_s15, %s1623_s16  }
  0x66   :  { %s1628_s25 = smov [#allocation17]   ;;  %s1629_s24 = smov [#allocation18]  }
  0x67   :  { %s105_s3 = sshll.u32 %s1628_s25, 4  ;;  %s118_s26 = sshll.u32 %s1629_s24, 4  ;;  %s106_s3 = int_to_ptr.vmem [resolvable:$true] %s105_s3  ;;  %s1812_s26 = int_to_ptr.vmem [resolvable:$true] %s118_s26 }
  0x68   :  { %s1542_s1 = scalar_lea.hbm %s2044_s8, 16 }
  0x69   :  { %p1543_p6 = scmp.ne.s32.totalorder %s2044_s8, %s1542_s1  ;;  %p1546_p7 = scmp.lt.u32.totalorder %s1542_s1, %s2044_s8 }
  0x6b   :  { %p1548_p8 = pnand %p1546_p7, %p1543_p6 }
  0x6d   :  { %1551 = shalt.err (!%p1548_p8)
}
  0x6e   :  { %s1552_s5 = scalar_lea.vmem %s106_s3, 16  ;;  %s1556_s23 = scalar_lea.vmem %s106_s3, 32 }
  0x6f   :  { %p1553_p9 = scmp.ne.s32.totalorder %s106_s3, %s1552_s5  ;;  %p1557_p10 = scmp.lt.s32.totalorder %s106_s3, %s106_s3 }
  0x70   :  { %p1558_p11 = scmp.lt.s32.totalorder %s1556_s23, %s1552_s5 }
  0x72   :  { %p1559_p12 = por %p1558_p11, %p1557_p10 }
  0x74   :  { %p1560_p13 = pnand %p1559_p12, %p1553_p9 }
  0x76   :  { %1563 = shalt.err (!%p1560_p13)
}
  0x77   :  { %108 = dma.hbm_to_vmem [thread:$0]  %s2044_s8, 16, %s106_s3, [#allocation16]  }
  0x78   :  { %s1564_s30 = scalar_lea.hbm %s2047_s11, 1024 }
  0x79   :  { %p1565_p0 = scmp.ne.s32.totalorder %s2047_s11, %s1564_s30  ;;  %p1568_p1 = scmp.lt.u32.totalorder %s1564_s30, %s2047_s11 }
  0x7b   :  { %p1570_p2 = pnand %p1568_p1, %p1565_p0 }
  0x7d   :  { %1573 = shalt.err (!%p1570_p2)
}
  0x7e   :  { %s1574_s25 = scalar_lea.vmem %s1812_s26, 1024  ;;  %p1579_p4 = scmp.lt.s32.totalorder %s1812_s26, %s1812_s26 }
  0x7f   :  { %p1575_p3 = scmp.ne.s32.totalorder %s1812_s26, %s1574_s25  ;;  %p1580_p5 = scmp.lt.s32.totalorder %s1574_s25, %s1574_s25 }
  0x81   :  { %p1581_p6 = por %p1580_p5, %p1579_p4 }
  0x83   :  { %p1582_p7 = pnand %p1581_p6, %p1575_p3 }
  0x85   :  { %1585 = shalt.err (!%p1582_p7)
}
  0x86   :  { %124 = dma.hbm_to_vmem [thread:$0]  %s2047_s11, 1024, %s1812_s26, [#allocation19], %s1622_s15, %s1622_s15, %s1623_s16  }
  0x87   :  { %1608 = dma.done.wait [#allocation7], 256  }
  0x88   :  { %1609 = vsyncadd [#allocation7], 4294967040 }
  0x89   :  { %1610 = dma.done.wait [#allocation10], 512  }
  0x8a   :  { %1611 = vsyncadd [#allocation10], 4294966784 }
  0x8b   :  { %1612 = dma.done.wait [#allocation13], 1024  }
  0x8c   :  { %1613 = vsyncadd [#allocation13], 4294966272 }
  0x8d   :  { %1614 = dma.done.wait [#allocation16], 528  }
  0x8e   :  { %1615 = vsyncadd [#allocation16], 4294966768 }
  0x8f   :  { %1616 = dma.done.wait [#allocation19], 1024  }
  0x90   :  { %1617 = vsyncadd [#allocation19], 4294966272  ;;  %vm162_vm0 = vcmask 261120   ;;  %v246_v0 = vld [vmem:[#allocation14] sm:$0xff]  ;;  %v247_v1 = vld [vmem:[#allocation14 + $0x8] sm:$0xff]  ;;  %vm434_vm1 = vcmask 64512  }
  0x91   :  { %v248_v2 = vld [vmem:[#allocation14 + $0x10] sm:$0xff]  ;;  %v1298_v3 = vpack.c.bf16 %v247_v1, %v246_v0  ;;  %v249_v4 = vld [vmem:[#allocation14 + $0x18] sm:$0xff]  ;;  %v244_v5 = vld [vmem:[#allocation9] sm:$0xff]  ;;  %s1630_s28 = smov 112   ;;  %vm704_vm3 = vcmask 523264   ;;  %s1633_s17 = smov 16  }
  0x92   :  { %v1302_v6 = vpack.c.bf16 %v249_v4, %v248_v2  ;;  %1209 = vmatprep.mubr.msk.f32.mxu1 %vm162_vm0, %v244_v5  ;;  %v151_v7 = vld [vmem:[#allocation12] sm:$0xff]  ;;  %v152_v8 = vld [vmem:[#allocation12 + $0x8] sm:$0xff]  ;;  %v153_v9 = vld [vmem:[#allocation12 + $0x10] sm:$0xff]  ;;  %s1634_s18 = smov 24   ;;  %vm956_vm4 = vcmask 130112   ;;  %vm967_vm5 = vcmask 195712  }
  0x93   :  { %1299 = vmatprep.subr.bf16.mxu1 %v1298_v3  ;;  %v1290_v10 = vpack.c.bf16 %v152_v8, %v151_v7  ;;  %v154_v11 = vld [vmem:[#allocation12 + $0x18] sm:$0xff]  ;;  %v149_v12 = vld [vmem:[#allocation6] sm:$0xff]  ;;  %v245_v14 = vld [vmem:[#allocation9 + $0x8] sm:$0xff]  ;;  %vm978_vm6 = vcmask 261312   ;;  %s1635_s30 = smov [#allocation20]  }
  0x94   :  { %1301 = vmatpush3.bf16.msra.mxu1 %v1298_v3  ;;  %v1294_v13 = vpack.c.bf16 %v154_v11, %v153_v9  ;;  %1198 = vmatprep.mubr.msk.f32.mxu0 %vm162_vm0, %v149_v12  ;;  %v150_v15 = vld [vmem:[#allocation6 + $0x8] sm:$0xff]  ;;  %v340_v16 = vld [vmem:[#allocation15] sm:$0xff]  ;;  %v341_v17 = vld [vmem:[#allocation15 + $0x8] sm:$0xff]  ;;  %s1082_s19 = sshll.u32 %s1635_s30, 4  ;;  %s1083_s19 = int_to_ptr.vmem [resolvable:$true] %s1082_s19 }
  0x95   :  { %1303 = vmatprep.subr.bf16.mxu1 %v1302_v6  ;;  %1291 = vmatprep.subr.bf16.mxu0 %v1290_v10  ;;  %v342_v18 = vld [vmem:[#allocation15 + $0x10] sm:$0xff]  ;;  %v1306_v19 = vpack.c.bf16 %v341_v17, %v340_v16  ;;  %v343_v20 = vld [vmem:[#allocation15 + $0x18] sm:$0xff]  ;;  %v1101_v24 = vld [vmem:[%s2042_s6] ss:$0 sm:$0xff]  ;;  %s1631_s6 = smov 120   ;;  %s1586_s21 = scalar_lea.vmem %s1083_s19, 256 }
  0x96   :  { %1293 = vmatpush3.bf16.msra.mxu0 %v1290_v10  ;;  %v1310_v21 = vpack.c.bf16 %v343_v20, %v342_v18  ;;  %v338_v22 = vld [vmem:[#allocation11] sm:$0xff]  ;;  %v339_v23 = vld [vmem:[#allocation11 + $0x8] sm:$0xff]  ;;  %v1098_v26 = vld [vmem:[%s2040_s4] ss:$0 sm:$0xff]  ;;  %s1632_s4 = smov 104   ;;  %p1587_p8 = scmp.ne.s32.totalorder %s1083_s19, %s1586_s21 }
  0x97   :  { %1295 = vmatprep.subr.bf16.mxu0 %v1294_v13  ;;  %vm1868_vm2 = vmpackc.low %vm434_vm1, %vm434_vm1  ;;  %v1104_v5 = vld [vmem:[#allocation17] ss:$0 sm:$0xff]  ;;  %p1591_p9 = scmp.lt.s32.totalorder %s1083_s19, %s1083_s19  ;;  %p1592_p10 = scmp.lt.s32.totalorder %s1586_s21, %s1586_s21 }
  0x98   :  { %1305 = vmatpush3.bf16.msra.mxu1 %v1302_v6  ;;  %v546_v20 = vld [vmem:[#allocation18 + $0x18] sm:$0xff] }
  0x99   :  { %v550_v38 = vld [vmem:[#allocation18 + $0x38] sm:$0xff]  ;;  %p1593_p11 = por %p1592_p10, %p1591_p9 }
  0x9a   :  { %1297 = vmatpush3.bf16.msra.mxu0 %v1294_v13 }
  0x9b   :  { %1210 = vmatmul.mubr.msk.f32.vlgmr.msra.gmra.mrb[0].mxu1 %vm162_vm0, %v245_v14  ;;  %1307 = vmatprep.subr.bf16.mxu0 %v1306_v19  ;;  %v544_v14 = vld [vmem:[#allocation18 + $0x8] sm:$0xff]  ;;  %p1594_p12 = pnand %p1593_p11, %p1587_p8 }
  0x9d   :  { %1199 = vmatmul.mubr.msk.f32.vlgmr.msra.gmra.mrb[0].mxu0 %vm162_vm0, %v150_v15  ;;  %v543_v15 = vld [vmem:[#allocation18] sm:$0xff] }
  0x9e   :  { %1309 = vmatpush3.bf16.msra.mxu0 %v1306_v19  ;;  %1220 = vmatprep.mubr.msk.f32.mxu0 %vm162_vm0, %v338_v22 }
  0x9f   :  { %1311 = vmatprep.subr.bf16.mxu0 %v1310_v21 }
  0xa2   :  { %1313 = vmatpush3.bf16.msra.mxu0 %v1310_v21 }
  0xa5   :  { %1221 = vmatmul.mubr.msk.f32.vlgmr.msra.gmra.mrb[2].mxu0 %vm162_vm0, %v339_v23 }
 0x16e   :  { %v1211_v25 = vpop.f32.mrb[0].mxu1 }
 0x16f   :  { %v335_v27 = vadd.f32 %v1211_v25, %v1101_v24  ;;  %v329_v28 = vpop.f32.mrb[1].mxu1 }
 0x170   :  { %v330_v29 = vadd.f32 %v1101_v24, %v329_v28  ;;  %v1200_v30 = vpop.f32.mrb[0].mxu0 }
 0x171   :  { %438 = vst.msk [vmem:[#allocation3 + $0x8] sm:$0xff] %vm434_vm1, %v335_v27  ;;  %v241_v31 = vadd.f32 %v1200_v30, %v1098_v26  ;;  %v235_v32 = vpop.f32.mrb[1].mxu0 }
 0x172   :  { %437 = vst.msk [vmem:[#allocation3] sm:$0xff] %vm434_vm1, %v330_v29  ;;  %479 = vrot.lane.b32.xlu1 %v330_v29, %s1630_s28  ;;  %453 = vrot.lane.b32.xlu0 %v330_v29, %s1631_s6  ;;  %v236_v33 = vadd.f32 %v1098_v26, %v235_v32  ;;  %v545_v26 = vld [vmem:[#allocation18 + $0x10] sm:$0xff] }
 0x173   :  { %v433_v34 = vmul.f32 0.35355338, %v241_v31  ;;  %v548_v31 = vld [vmem:[#allocation18 + $0x28] sm:$0xff] }
 0x174   :  { %v432_v35 = vmul.f32 0.35355338, %v236_v33 }
 0x175   :  { %436 = vst.msk [vmem:[#allocation2 + $0x8] sm:$0xff] %vm434_vm1, %v433_v34 }
 0x176   :  { %481 = vrot.lane.b32.xlu1 %v335_v27, %s1630_s28  ;;  %455 = vrot.lane.b32.xlu0 %v335_v27, %s1631_s6  ;;  %435 = vst.msk [vmem:[#allocation2] sm:$0xff] %vm434_vm1, %v432_v35 }
 0x178   :  { %v528_v36 = vld [vmem:[#allocation3 + $0x8] sm:$0xff]  ;;  %v1222_v6 = vpop.f32.mrb[2].mxu0 }
 0x179   :  { %v527_v37 = vld [vmem:[#allocation3] sm:$0xff]  ;;  %v1916_v7 = vadd.f32 %v1222_v6, %v1104_v5  ;;  %v423_v8 = vpop.f32.mrb[3].mxu0 }
 0x17a   :  { %505 = vrot.lane.b32.xlu1 %v335_v27, %s1632_s4  ;;  %503 = vrot.lane.b32.xlu0 %v330_v29, %s1632_s4  ;;  %v1314_v39 = vpack.c.bf16 %v528_v36, %v527_v37  ;;  %v1918_v9 = vadd.f32 %v1104_v5, %v423_v8  ;;  %v547_v27 = vld [vmem:[#allocation18 + $0x20] sm:$0xff] }
 0x17b   :  { %440 = vst.msk [vmem:[#allocation4 + $0x8] sm:$0xff] %vm434_vm1, %v1916_v7 }
 0x17c   :  { %1316 = vmatprep.subr.msk.bf16.mxu1 %vm1868_vm2, %v1314_v39  ;;  %v520_v63 = vld [vmem:[#allocation2 + $0x8] sm:$0xff]  ;;  %439 = vst.msk [vmem:[#allocation4] sm:$0xff] %vm434_vm1, %v1918_v9 }
 0x17d   :  { %1319 = vmatpush3.bf16.xpose.msk.msra.mxu1 %vm1868_vm2, %v1314_v39  ;;  %v519_v40 = vld [vmem:[#allocation2] sm:$0xff] }
 0x17e   :  { %445 = vrot.lane.b32.xlu1 %v433_v34, %s1631_s6  ;;  %443 = vrot.lane.b32.xlu0 %v432_v35, %s1631_s6 }
 0x17f   :  { %1239 = vmatprep.mubr.msk.f32.mxu1 %vm434_vm1, %v519_v40 }
 0x182   :  { %473 = vrot.lane.b32.xlu1 %v433_v34, %s1630_s28  ;;  %471 = vrot.lane.b32.xlu0 %v432_v35, %s1630_s28  ;;  %v536_v10 = vld [vmem:[#allocation4 + $0x8] sm:$0xff] }
 0x183   :  { %v535_v11 = vld [vmem:[#allocation4] sm:$0xff] }
 0x184   :  { %v1338_v12 = vpack.c.bf16 %v536_v10, %v535_v11 }
 0x186   :  { %497 = vrot.lane.b32.xlu1 %v433_v34, %s1632_s4  ;;  %495 = vrot.lane.b32.xlu0 %v432_v35, %s1632_s4 }
 0x187   :  { %1339 = vmatprep.subr.bf16.mxu0 %v1338_v12 }
 0x188   :  { %1341 = vmatpush3.bf16.msra.mxu0 %v1338_v12 }
 0x18a   :  { %463 = vrot.lane.b32.xlu1 %v1918_v9, %s1631_s6 }
 0x1e4   :  { %v480_v41 = vpop.permute.xlu1 %479  ;;  %v454_v42 = vpop.permute.xlu0 %453 }
 0x1e5   :  { %485 = vst.msk [vmem:[#allocation3 + $0x20] sm:$0xff] %vm434_vm1, %v480_v41  ;;  %459 = vst.msk [vmem:[#allocation3 + $0x10] sm:$0xff] %vm434_vm1, %v454_v42 }
 0x1e8   :  { %v482_v43 = vpop.permute.xlu1 %481  ;;  %v456_v44 = vpop.permute.xlu0 %455 }
 0x1e9   :  { %486 = vst.msk [vmem:[#allocation3 + $0x28] sm:$0xff] %vm434_vm1, %v482_v43  ;;  %460 = vst.msk [vmem:[#allocation3 + $0x18] sm:$0xff] %vm434_vm1, %v456_v44  ;;  %v549_v43 = vld [vmem:[#allocation18 + $0x30] sm:$0xff] }
 0x1ec   :  { %v506_v45 = vpop.permute.xlu1 %505  ;;  %v504_v46 = vpop.permute.xlu0 %503  ;;  %v529_v47 = vld [vmem:[#allocation3 + $0x10] sm:$0xff]  ;;  %v531_v53 = vld [vmem:[#allocation3 + $0x20] sm:$0xff] }
 0x1ed   :  { %510 = vst.msk [vmem:[#allocation3 + $0x38] sm:$0xff] %vm434_vm1, %v506_v45  ;;  %509 = vst.msk [vmem:[#allocation3 + $0x30] sm:$0xff] %vm434_vm1, %v504_v46 }
 0x1f0   :  { %v530_v48 = vld [vmem:[#allocation3 + $0x18] sm:$0xff]  ;;  %v532_v49 = vld [vmem:[#allocation3 + $0x28] sm:$0xff]  ;;  %v446_v50 = vpop.permute.xlu1 %445  ;;  %v444_v51 = vpop.permute.xlu0 %443 }
 0x1f1   :  { %v1320_v52 = vpack.c.bf16 %v530_v48, %v529_v47  ;;  %450 = vst.msk [vmem:[#allocation2 + $0x18] sm:$0xff] %vm434_vm1, %v446_v50  ;;  %449 = vst.msk [vmem:[#allocation2 + $0x10] sm:$0xff] %vm434_vm1, %v444_v51  ;;  %v1326_v54 = vpack.c.bf16 %v532_v49, %v531_v53 }
 0x1f3   :  { %1322 = vmatprep.subr.msk.bf16.mxu1 %vm1868_vm2, %v1320_v52 }
 0x1f4   :  { %1325 = vmatpush3.bf16.xpose.msk.msra.mxu1 %vm1868_vm2, %v1320_v52  ;;  %v474_v55 = vpop.permute.xlu1 %473  ;;  %v472_v56 = vpop.permute.xlu0 %471  ;;  %v533_v57 = vld [vmem:[#allocation3 + $0x30] sm:$0xff]  ;;  %v534_v58 = vld [vmem:[#allocation3 + $0x38] sm:$0xff] }
 0x1f5   :  { %1328 = vmatprep.subr.msk.bf16.mxu1 %vm1868_vm2, %v1326_v54  ;;  %478 = vst.msk [vmem:[#allocation2 + $0x28] sm:$0xff] %vm434_vm1, %v474_v55  ;;  %477 = vst.msk [vmem:[#allocation2 + $0x20] sm:$0xff] %vm434_vm1, %v472_v56  ;;  %v1332_v61 = vpack.c.bf16 %v534_v58, %v533_v57 }
 0x1f8   :  { %v498_v59 = vpop.permute.xlu1 %497  ;;  %v496_v60 = vpop.permute.xlu0 %495  ;;  %v521_v62 = vld [vmem:[#allocation2 + $0x10] sm:$0xff]  ;;  %v522_v0 = vld [vmem:[#allocation2 + $0x18] sm:$0xff] }
 0x1f9   :  { %502 = vst.msk [vmem:[#allocation2 + $0x38] sm:$0xff] %vm434_vm1, %v498_v59  ;;  %501 = vst.msk [vmem:[#allocation2 + $0x30] sm:$0xff] %vm434_vm1, %v496_v60 }
 0x1fc   :  { %1331 = vmatpush3.bf16.xpose.msk.msra.mxu1 %vm1868_vm2, %v1326_v54  ;;  %v523_v1 = vld [vmem:[#allocation2 + $0x20] sm:$0xff]  ;;  %v524_v2 = vld [vmem:[#allocation2 + $0x28] sm:$0xff]  ;;  %v464_v13 = vpop.permute.xlu1 %463 }
 0x1fd   :  { %1334 = vmatprep.subr.msk.bf16.mxu1 %vm1868_vm2, %v1332_v61  ;;  %469 = vst.msk [vmem:[#allocation4 + $0x10] sm:$0xff] %vm434_vm1, %v464_v13 }
 0x200   :  { %v525_v3 = vld [vmem:[#allocation2 + $0x30] sm:$0xff]  ;;  %v526_v4 = vld [vmem:[#allocation2 + $0x38] sm:$0xff] }
 0x204   :  { %1337 = vmatpush3.bf16.xpose.msk.msra.mxu1 %vm1868_vm2, %v1332_v61 }
 0x20b   :  { %1240 = vmatmul.mubr.msk.f32.vlgmr.msra.gmra.mrb[2].mxu1 %vm434_vm1, %v520_v63 }
 0x20c   :  { %1242 = vmatprep.mubr.msk.f32.mxu1 %vm434_vm1, %v521_v62 }
 0x20f   :  { %1243 = vmatmul.mubr.msk.f32.gmra.mrb[4].mxu1 %vm434_vm1, %v522_v0 }
 0x210   :  { %1245 = vmatprep.mubr.msk.f32.mxu1 %vm434_vm1, %v523_v1 }
 0x213   :  { %1246 = vmatmul.mubr.msk.f32.gmra.mrb[6].mxu1 %vm434_vm1, %v524_v2 }
 0x214   :  { %1248 = vmatprep.mubr.msk.f32.mxu1 %vm434_vm1, %v525_v3 }
 0x217   :  { %1249 = vmatmul.mubr.msk.f32.gmra.mrb[8].mxu1 %vm434_vm1, %v526_v4 }
 0x2de   :  { %v1241_v16 = vpop.f32.mrb[2].mxu1 }
 0x2df   :  { %v671_v17 = vadd.f32 %v1241_v16, %v544_v14  ;;  %v665_v18 = vpop.f32.mrb[3].mxu1 }
 0x2e0   :  { %v666_v19 = vadd.f32 %v665_v18, %v543_v15  ;;  %v537_v18 = vld [vmem:[#allocation4 + $0x10] sm:$0xff] }
 0x2e1   :  { %v708_v21 = vsel %vm704_vm3, %v671_v17, -inf }
 0x2e2   :  { %709 = vmax.xlane.f32.xlu1 %v708_v21  ;;  %v1244_v22 = vpop.f32.mrb[4].mxu1  ;;  %v705_v23 = vsel %vm704_vm3, %v666_v19, -inf }
 0x2e3   :  { %v681_v24 = vadd.f32 %v1244_v22, %v546_v20  ;;  %v675_v25 = vpop.f32.mrb[5].mxu1  ;;  %706 = vmax.xlane.f32.xlu0 %v705_v23 }
 0x2e4   :  { %v676_v29 = vadd.f32 %v675_v25, %v545_v26 }
 0x2e5   :  { %v714_v28 = vsel %vm704_vm3, %v681_v24, -inf }
 0x2e6   :  { %v1247_v30 = vpop.f32.mrb[6].mxu1  ;;  %v711_v37 = vsel %vm704_vm3, %v676_v29, -inf }
 0x2e7   :  { %v685_v32 = vpop.f32.mrb[7].mxu1  ;;  %715 = vmax.xlane.f32.xlu0 %v714_v28  ;;  %v691_v34 = vadd.f32 %v1247_v30, %v548_v31 }
 0x2e8   :  { %v686_v33 = vadd.f32 %v685_v32, %v547_v27 }
 0x2e9   :  { %v720_v41 = vsel %vm704_vm3, %v691_v34, -inf }
 0x2ea   :  { %v1250_v35 = vpop.f32.mrb[8].mxu1  ;;  %v717_v36 = vsel %vm704_vm3, %v686_v33, -inf }
 0x2eb   :  { %v695_v39 = vpop.f32.mrb[9].mxu1  ;;  %718 = vmax.xlane.f32.xlu1 %v717_v36  ;;  %712 = vmax.xlane.f32.xlu0 %v711_v37  ;;  %v701_v40 = vadd.f32 %v1250_v35, %v550_v38 }
 0x2ec   :  { %v1938_v44 = vadd.f32 %v695_v39, %v549_v43 }
 0x2ed   :  { %v726_v42 = vsel %vm704_vm3, %v701_v40, -inf }
 0x2ee   :  { %v723_v45 = vsel %vm704_vm3, %v1938_v44, -inf }
 0x2ef   :  { %721 = vmax.xlane.f32.xlu0 %v720_v41 }
 0x2f3   :  { %727 = vmax.xlane.f32.xlu0 %v726_v42 }
 0x2fc   :  { %487 = vrot.lane.b32.xlu1 %v1918_v9, %s1630_s28 }
 0x309   :  { %465 = vrot.lane.b32.xlu0 %v1916_v7, %s1631_s6 }
 0x320   :  { %724 = vmax.xlane.f32.xlu1 %v723_v45 }
 0x36f   :  { %v710_v46 = vpop.xlane.xlu1 %709 }
 0x370   :  { %v730_v47 = vsub.f32 %v671_v17, %v710_v46  ;;  %v707_v48 = vpop.xlane.xlu0 %706 }
 0x371   :  { %v729_v49 = vsub.f32 %v666_v19, %v707_v48 }
 0x372   :  { %v739_v50 = vmul.f32 1.442695, %v730_v47 }
 0x373   :  { %v737_v51 = vmul.f32 1.442695, %v729_v49 }
 0x374   :  { %1378 = vpow2.f32 %v739_v50  ;;  %v716_v52 = vpop.xlane.xlu0 %715 }
 0x375   :  { %1380 = vpow2.f32 %v737_v51  ;;  %v732_v53 = vsub.f32 %v681_v24, %v716_v52 }
 0x377   :  { %v743_v54 = vmul.f32 1.442695, %v732_v53 }
 0x378   :  { %v719_v55 = vpop.xlane.xlu1 %718  ;;  %v713_v56 = vpop.xlane.xlu0 %712 }
 0x379   :  { %1382 = vpow2.f32 %v743_v54  ;;  %v733_v57 = vsub.f32 %v686_v33, %v719_v55  ;;  %v731_v58 = vsub.f32 %v676_v29, %v713_v56 }
 0x37b   :  { %v741_v59 = vmul.f32 1.442695, %v731_v58  ;;  %v745_v60 = vmul.f32 1.442695, %v733_v57 }
 0x37c   :  { %v488_v61 = vpop.permute.xlu1 %487  ;;  %v722_v62 = vpop.xlane.xlu0 %721 }
 0x37d   :  { %493 = vst.msk [vmem:[#allocation4 + $0x20] sm:$0xff] %vm434_vm1, %v488_v61  ;;  %v734_v63 = vsub.f32 %v691_v34, %v722_v62  ;;  %1384 = vpow2.f32 %v741_v59 }
 0x37e   :  { %v1943_v0 = vpop.eup %1378  ;;  %1386 = vpow2.f32 %v745_v60 }
 0x37f   :  { %v1381_v1 = vpop.eup %1380  ;;  %v747_v2 = vmul.f32 1.442695, %v734_v63  ;;  %v756_v3 = vsel %vm704_vm3, %v1943_v0, 0.0 }
 0x380   :  { %757 = vadd.xlane.f32.xlu0 %v756_v3  ;;  %v728_v4 = vpop.xlane.xlu0 %727  ;;  %v753_v5 = vsel %vm704_vm3, %v1381_v1, 0.0 }
 0x381   :  { %1388 = vpow2.f32 %v747_v2  ;;  %v736_v6 = vsub.f32 %v701_v40, %v728_v4  ;;  %754 = vadd.xlane.f32.xlu1 %v753_v5 }
 0x383   :  { %v1948_v8 = vpop.eup %1382  ;;  %v751_v10 = vmul.f32 1.442695, %v736_v6 }
 0x384   :  { %v466_v11 = vpop.permute.xlu0 %465  ;;  %v762_v12 = vsel %vm704_vm3, %v1948_v8, 0.0 }
 0x385   :  { %1390 = vpow2.f32 %v751_v10  ;;  %470 = vst.msk [vmem:[#allocation4 + $0x18] sm:$0xff] %vm434_vm1, %v466_v11  ;;  %763 = vadd.xlane.f32.xlu0 %v762_v12 }
 0x387   :  { %v1953_v13 = vpop.eup %1384 }
 0x388   :  { %v759_v14 = vsel %vm704_vm3, %v1953_v13, 0.0  ;;  %v1957_v15 = vpop.eup %1386 }
 0x389   :  { %760 = vadd.xlane.f32.xlu1 %v759_v14  ;;  %v765_v20 = vsel %vm704_vm3, %v1957_v15, 0.0 }
 0x38b   :  { %v1959_v16 = vpop.eup %1388 }
 0x38c   :  { %v768_v17 = vsel %vm704_vm3, %v1959_v16, 0.0  ;;  %v538_v19 = vld [vmem:[#allocation4 + $0x18] sm:$0xff] }
 0x38d   :  { %769 = vadd.xlane.f32.xlu0 %v768_v17  ;;  %v1342_v21 = vpack.c.bf16 %v538_v19, %v537_v18  ;;  %766 = vadd.xlane.f32.xlu1 %v765_v20 }
 0x38f   :  { %v1965_v22 = vpop.eup %1390  ;;  %1343 = vmatprep.subr.bf16.mxu0 %v1342_v21 }
 0x390   :  { %1345 = vmatpush3.bf16.msra.mxu0 %v1342_v21  ;;  %v774_v23 = vsel %vm704_vm3, %v1965_v22, 0.0 }
 0x391   :  { %775 = vadd.xlane.f32.xlu0 %v774_v23 }
 0x39e   :  { %511 = vrot.lane.b32.xlu1 %v1918_v9, %s1632_s4 }
 0x3a7   :  { %489 = vrot.lane.b32.xlu0 %v1916_v7, %s1630_s28 }
 0x3ad   :  { %v725_v24 = vpop.xlane.xlu1 %724 }
 0x3ae   :  { %v735_v25 = vsub.f32 %v1938_v44, %v725_v24 }
 0x3b0   :  { %v749_v26 = vmul.f32 1.442695, %v735_v25  ;;  %v984_v25 = vld [vmem:[%s2045_s9 + $0x8] sm:$0xff] }
 0x3b2   :  { %1392 = vpow2.f32 %v749_v26 }
 0x3bc   :  { %v1974_v27 = vpop.eup %1392 }
 0x3bd   :  { %v771_v28 = vsel %vm704_vm3, %v1974_v27, 0.0 }
 0x3c2   :  { %772 = vadd.xlane.f32.xlu1 %v771_v28  ;;  %v986_v28 = vld [vmem:[%s2045_s9 + $0x18] sm:$0xff] }
 0x3d3   :  { %513 = vrot.lane.b32.xlu1 %v1916_v7, %s1632_s4  ;;  %v539_v7 = vld [vmem:[#allocation4 + $0x20] sm:$0xff] }
 0x40d   :  { %v758_v9 = vpop.xlane.xlu0 %757 }
 0x40e   :  { %v755_v29 = vpop.xlane.xlu1 %754 }
 0x40f   :  { %1394 = vrcp.f32 %v755_v29 }
 0x410   :  { %1396 = vrcp.f32 %v758_v9 }
 0x412   :  { %v764_v30 = vpop.xlane.xlu0 %763 }
 0x416   :  { %v761_v31 = vpop.xlane.xlu1 %760 }
 0x417   :  { %1398 = vrcp.f32 %v761_v31 }
 0x418   :  { %1400 = vrcp.f32 %v764_v30 }
 0x419   :  { %v1395_v32 = vpop.eup %1394 }
 0x41a   :  { %v785_v33 = vmul.f32 %v1395_v32, %v755_v29  ;;  %v770_v34 = vpop.xlane.xlu0 %769  ;;  %v767_v35 = vpop.xlane.xlu1 %766 }
 0x41b   :  { %1402 = vrcp.f32 %v767_v35  ;;  %v1397_v45 = vpop.eup %1396 }
 0x41c   :  { %v793_v36 = vsub.f32 2.0, %v785_v33  ;;  %1404 = vrcp.f32 %v770_v34  ;;  %v786_v48 = vmul.f32 %v1397_v45, %v758_v9 }
 0x41e   :  { %v801_v37 = vmul.f32 %v1395_v32, %v793_v36  ;;  %v776_v38 = vpop.xlane.xlu0 %775  ;;  %v512_v39 = vpop.permute.xlu1 %511  ;;  %v794_v52 = vsub.f32 2.0, %v786_v48 }
 0x41f   :  { %517 = vst.msk [vmem:[#allocation4 + $0x30] sm:$0xff] %vm434_vm1, %v512_v39 }
 0x420   :  { %v809_v40 = vmul.f32 %v1381_v1, %v801_v37  ;;  %v802_v60 = vmul.f32 %v1397_v45, %v794_v52 }
 0x421   :  { %v1399_v46 = vpop.eup %1398 }
 0x422   :  { %1267 = vmatprep.mubr.msk.f32.mxu0 %vm704_vm3, %v809_v40  ;;  %v490_v41 = vpop.permute.xlu0 %489  ;;  %v1401_v49 = vpop.eup %1400  ;;  %v787_v50 = vmul.f32 %v1399_v46, %v761_v31  ;;  %v810_v5 = vmul.f32 %v1943_v0, %v802_v60 }
 0x423   :  { %494 = vst.msk [vmem:[#allocation4 + $0x28] sm:$0xff] %vm434_vm1, %v490_v41  ;;  %v788_v53 = vmul.f32 %v1401_v49, %v764_v30 }
 0x424   :  { %v795_v55 = vsub.f32 2.0, %v787_v50 }
 0x425   :  { %v1403_v51 = vpop.eup %1402  ;;  %v796_v61 = vsub.f32 2.0, %v788_v53 }
 0x426   :  { %v1405_v54 = vpop.eup %1404  ;;  %v789_v56 = vmul.f32 %v1403_v51, %v767_v35  ;;  %v541_v58 = vld [vmem:[#allocation4 + $0x30] sm:$0xff]  ;;  %v803_v2 = vmul.f32 %v1399_v46, %v795_v55 }
 0x427   :  { %v790_v62 = vmul.f32 %v1405_v54, %v770_v34  ;;  %v804_v6 = vmul.f32 %v1401_v49, %v796_v61 }
 0x428   :  { %v797_v3 = vsub.f32 2.0, %v789_v56  ;;  %v811_v12 = vmul.f32 %v1953_v13, %v803_v2 }
 0x429   :  { %v798_v10 = vsub.f32 2.0, %v790_v62  ;;  %v812_v18 = vmul.f32 %v1948_v8, %v804_v6 }
 0x42a   :  { %v540_v42 = vld [vmem:[#allocation4 + $0x28] sm:$0xff]  ;;  %v805_v14 = vmul.f32 %v1403_v51, %v797_v3 }
 0x42b   :  { %v1346_v43 = vpack.c.bf16 %v540_v42, %v539_v7  ;;  %v806_v19 = vmul.f32 %v1405_v54, %v798_v10  ;;  %v1131_v42 = vld [vmem:[%s2046_s10] ss:$0 sm:$0xff] }
 0x42c   :  { %v813_v21 = vmul.f32 %v1957_v15, %v805_v14  ;;  %v983_v15 = vld [vmem:[%s2045_s9] sm:$0xff] }
 0x42d   :  { %1347 = vmatprep.subr.bf16.mxu0 %v1346_v43  ;;  %v814_v0 = vmul.f32 %v1959_v16, %v806_v19  ;;  %v1354_v16 = vpack.c.bf16 %v984_v25, %v983_v15 }
 0x42e   :  { %1349 = vmatpush3.bf16.msra.mxu0 %v1346_v43 }
 0x44f   :  { %v773_v44 = vpop.xlane.xlu1 %772 }
 0x450   :  { %1406 = vrcp.f32 %v773_v44 }
 0x451   :  { %1408 = vrcp.f32 %v776_v38 }
 0x453   :  { %v514_v47 = vpop.permute.xlu1 %513 }
 0x454   :  { %518 = vst.msk [vmem:[#allocation4 + $0x38] sm:$0xff] %vm434_vm1, %v514_v47 }
 0x45a   :  { %v1407_v57 = vpop.eup %1406 }
 0x45b   :  { %v542_v59 = vld [vmem:[#allocation4 + $0x38] sm:$0xff]  ;;  %v1409_v1 = vpop.eup %1408  ;;  %v791_v4 = vmul.f32 %v1407_v57, %v773_v44 }
 0x45c   :  { %v1350_v63 = vpack.c.bf16 %v542_v59, %v541_v58  ;;  %v792_v11 = vmul.f32 %v1409_v1, %v776_v38 }
 0x45d   :  { %v799_v17 = vsub.f32 2.0, %v791_v4 }
 0x45e   :  { %1351 = vmatprep.subr.bf16.mxu0 %v1350_v63  ;;  %v800_v20 = vsub.f32 2.0, %v792_v11 }
 0x45f   :  { %1353 = vmatpush3.bf16.msra.mxu0 %v1350_v63  ;;  %v807_v23 = vmul.f32 %v1407_v57, %v799_v17 }
 0x460   :  { %v808_v13 = vmul.f32 %v1409_v1, %v800_v20  ;;  %1355 = vmatprep.subr.bf16.mxu0 %v1354_v16 }
 0x461   :  { %v815_v24 = vmul.f32 %v1974_v27, %v807_v23 }
 0x462   :  { %1268 = vmatmul.mubr.msk.f32.vlgmr.msra.gmra.mrb[4].mxu0 %vm704_vm3, %v810_v5  ;;  %v816_v8 = vmul.f32 %v1965_v22, %v808_v13  ;;  %v985_v22 = vld [vmem:[%s2045_s9 + $0x10] sm:$0xff] }
 0x463   :  { %1270 = vmatprep.mubr.msk.f32.mxu0 %vm704_vm3, %v811_v12  ;;  %1357 = vmatpush3.bf16.msra.mxu0 %v1354_v16  ;;  %v1358_v29 = vpack.c.bf16 %v986_v28, %v985_v22 }
 0x465   :  { %1359 = vmatprep.subr.bf16.mxu0 %v1358_v29 }
 0x466   :  { %1271 = vmatmul.mubr.msk.f32.gmra.mrb[6].mxu0 %vm704_vm3, %v812_v18 }
 0x467   :  { %1273 = vmatprep.mubr.msk.f32.mxu0 %vm704_vm3, %v813_v21  ;;  %1361 = vmatpush3.bf16.msra.mxu0 %v1358_v29 }
 0x46a   :  { %1274 = vmatmul.mubr.msk.f32.gmra.mrb[8].mxu0 %vm704_vm3, %v814_v0 }
 0x46b   :  { %1276 = vmatprep.mubr.msk.f32.mxu0 %vm704_vm3, %v815_v24 }
 0x46e   :  { %1277 = vmatmul.mubr.msk.f32.gmra.mrb[10].mxu0 %vm704_vm3, %v816_v8 }
 0x535   :  { %v1269_v26 = vpop.f32.mrb[4].mxu0 }
 0x536   :  { %947 = vst.msk [vmem:[#allocation5 + $0x8] sm:$0xff] %vm434_vm1, %v1269_v26  ;;  %v907_v27 = vpop.f32.mrb[5].mxu0 }
 0x537   :  { %946 = vst.msk [vmem:[#allocation5] sm:$0xff] %vm434_vm1, %v907_v27 }
 0x539   :  { %v1272_v9 = vpop.f32.mrb[6].mxu0 }
 0x53a   :  { %952 = vrot.lane.b32.xlu1 %v1272_v9, %s1623_s16  ;;  %v917_v30 = vpop.f32.mrb[7].mxu0 }
 0x53b   :  { %950 = vrot.lane.b32.xlu0 %v917_v30, %s1623_s16 }
 0x53d   :  { %v1275_v31 = vpop.f32.mrb[8].mxu0 }
 0x53e   :  { %963 = vrot.lane.b32.xlu1 %v1275_v31, %s1633_s17  ;;  %v927_v32 = vpop.f32.mrb[9].mxu0 }
 0x53f   :  { %961 = vrot.lane.b32.xlu0 %v927_v32, %s1633_s17 }
 0x541   :  { %v1278_v33 = vpop.f32.mrb[10].mxu0 }
 0x542   :  { %974 = vrot.lane.b32.xlu1 %v1278_v33, %s1634_s18  ;;  %v937_v34 = vpop.f32.mrb[11].mxu0 }
 0x543   :  { %972 = vrot.lane.b32.xlu0 %v937_v34, %s1634_s18 }
 0x5ac   :  { %v953_v35 = vpop.permute.xlu1 %952 }
 0x5ad   :  { %958 = vst.msk [vmem:[#allocation5 + $0x8] sm:$0xff] %vm956_vm4, %v953_v35  ;;  %v951_v36 = vpop.permute.xlu0 %950 }
 0x5ae   :  { %957 = vst.msk [vmem:[#allocation5] sm:$0xff] %vm956_vm4, %v951_v36 }
 0x5b0   :  { %v964_v37 = vpop.permute.xlu1 %963 }
 0x5b1   :  { %969 = vst.msk [vmem:[#allocation5 + $0x8] sm:$0xff] %vm967_vm5, %v964_v37  ;;  %v962_v38 = vpop.permute.xlu0 %961 }
 0x5b2   :  { %968 = vst.msk [vmem:[#allocation5] sm:$0xff] %vm967_vm5, %v962_v38 }
 0x5b4   :  { %v975_v39 = vpop.permute.xlu1 %974 }
 0x5b5   :  { %980 = vst.msk [vmem:[#allocation5 + $0x8] sm:$0xff] %vm978_vm6, %v975_v39  ;;  %v973_v40 = vpop.permute.xlu0 %972 }
 0x5b6   :  { %979 = vst.msk [vmem:[#allocation5] sm:$0xff] %vm978_vm6, %v973_v40 }
 0x5bc   :  { %v982_v7 = vld [vmem:[#allocation5 + $0x8] sm:$0xff] }
 0x5bd   :  { %v981_v41 = vld [vmem:[#allocation5] sm:$0xff] }
 0x5be   :  { %1287 = vmatprep.mubr.msk.f32.mxu0 %vm162_vm0, %v981_v41 }
 0x5bf   :  { %1288 = vmatmul.mubr.msk.f32.vlgmr.msra.gmra.mrb[12].mxu0 %vm162_vm0, %v982_v7 }
 0x692   :  { %v1289_v43 = vpop.f32.mrb[12].mxu0 }
 0x693   :  { %v1072_v44 = vadd.f32 %v1289_v43, %v1131_v42  ;;  %v1066_v45 = vpop.f32.mrb[13].mxu0 }
 0x694   :  { %v1067_v46 = vadd.f32 %v1131_v42, %v1066_v45 }
 0x695   :  { %1076 = vst.msk [vmem:[#allocation20 + $0x8] sm:$0xff] %vm162_vm0, %v1072_v44 }
 0x696   :  { %1075 = vst.msk [vmem:[#allocation20] sm:$0xff] %vm162_vm0, %v1067_v46 }
 0x697   :  { %1597 = shalt.err (!%p1594_p12)
}
 0x698   :  { %s1598_s20 = scalar_lea.hbm %s2048_s12, 256 }
 0x699   :  { %p1599_p13 = scmp.ne.s32.totalorder %s2048_s12, %s1598_s20  ;;  %p1602_p0 = scmp.lt.u32.totalorder %s1598_s20, %s2048_s12 }
 0x69b   :  { %p1604_p1 = pnand %p1602_p0, %p1599_p13 }
 0x69d   :  { %1607 = shalt.err (!%p1604_p1)
}
 0x69e   :  { %1088 = dma.vmem_to_hbm [thread:$0]  %s1083_s19, 256, %s2048_s12, [#allocation8], %s1622_s15, %s1622_s15, %s1623_s16  }
 0x69f   :  { %1618 = dma.done.wait [#allocation8], 256  }
 0x6a0   :  { %1619 = vsyncadd [#allocation8], 4294967040 }
 0x6a1   :  { %1092 = vsyncpa [#allocation7], 1 }
 0x6a2   :  { %1093 = vsyncpa [#allocation10], 1 }
 0x6a3   :  { %1094 = vsyncpa [#allocation13], 1 }
 0x6a4   :  { %1095 = vsyncpa [#allocation16], 1 }
 0x6a5   :  { %1096 = vsyncpa [#allocation19], 1 }
 0x6a6   :  { %1097 = vsyncpa [#allocation8], 1 }

</bundles_post_ra>
